<compile_context>
chip_gen: v6e
topology: v6e:2x2x1
jax: 0.10.0
libtpu: 0.0.40
codegen_flags: <defaults>
</compile_context>

<pallas_src>
import functools
import math

import jax
import jax.numpy as jnp
from jax.experimental import pallas as pl
from jax.experimental.pallas import tpu as pltpu


def _attn_lbsa_sigmoid_kernel(x_ref, w_ref, b_ref, c_ref, *rest, has_mask):
    # x_ref:    (TB, S, F)   batch-coalesced input block (compute dtype, bf16 default)
    # w_ref:    (F, F)       attention weight matrix (compute dtype)
    # b_ref:    (1, F)       bias (f32)
    # c_ref:    (1, F)       context vector as a row (f32)
    # mask_ref: (TB, S)      lane-dense mask (f32), only when has_mask
    # out_ref:  (TB, F)      weighted-sum output block (lane-dense F)
    # a_ref:    (TB, S)      attention-weight output block (f32, lane-dense S)
    if has_mask:
        mask_ref, out_ref, a_ref = rest
    else:
        mask_ref = None
        out_ref, a_ref = rest

    TB, S, F = x_ref.shape
    x3 = x_ref[...]                           # (TB, S, F)
    x2 = x3.reshape(TB * S, F)                # layout no-op (S % 8 == 0 by wrapper)

    # eij = tanh(x @ W + b): single (TB*S, F) @ (F, F) MXU matmul, f32 accumulate.
    eij = jnp.dot(x2, w_ref[...], preferred_element_type=jnp.float32) + b_ref[...]
    eij = jnp.tanh(eij)                       # EUP

    # e = eij @ context -> VPU multiply + lane (XLU) reduce; avoids an N=1 MXU op.
    e = jnp.sum(eij * c_ref[...], axis=-1, keepdims=True)        # (TB*S, 1) f32

    # a = sigmoid(e) [* mask]
    a3 = jax.nn.sigmoid(e).reshape(TB, S, 1)                      # layout no-op
    if has_mask:
        # Tiny relayout of the lane-dense mask into sublane layout (TB*S scalars).
        a3 = a3 * mask_ref[...].reshape(TB, S, 1)

    # Lane-dense store of attention weights (tiny relayout of TB*S f32 scalars).
    a_ref[...] = a3.reshape(TB, S).astype(a_ref.dtype)

    # Weighted sum over steps in f32: broadcast a across F lanes, sublane reduce.
    weighted = x3.astype(jnp.float32) * a3                         # (TB, S, F)
    out_ref[...] = jnp.sum(weighted, axis=1).astype(out_ref.dtype)


def _round_up(n, m):
    return -(-n // m) * m


def _vmem_capacity_bytes():
    try:
        return int(pltpu.get_tpu_info().vmem_capacity_bytes)
    except Exception:
        return 64 * 2**20      # v7x per-TensorCore floor; safe on all generations


def _choose_batch_tile(B, S, F, x_bytes, vmem_cap):
    """Batch elements per grid step (S already padded to a sublane multiple).

    TB is a multiple of 8 (or TB == B for small B) so the (TB, F)/(TB, S) blocks
    satisfy the (8, 128) tiling rule after B is padded to a TB multiple."""
    # Grid-invariant footprint (single-buffered weight + bias + context).
    fixed = F * F * x_bytes + 2 * 4 * F
    # Per (batch*step) row: double-buffered x + f32 eij + f32 x-cast + f32 weighted.
    per_row = F * (2 * x_bytes + 12) + 32
    budget_rows = max(S, (max(0, int(0.40 * vmem_cap) - fixed)) // per_row)
    # Row sweet spot: bigger on 128 MiB parts (v5e/v6e), smaller on v7x (64 MiB).
    target_rows = 2048 if vmem_cap >= 96 * 2**20 else 512
    rows = min(target_rows, budget_rows)
    tb = max(1, rows // S)
    if tb >= B:
        if B >= 16:
            # Keep >= 2 grid steps so the "parallel" axis can shard across the
            # two TensorCores on v7x; keep TB a multiple of 8.
            tb = _round_up(_round_up(B, 2) // 2, 8)
        else:
            tb = B
    else:
        tb = max(8, (tb // 8) * 8)
    return tb


# Probe result cache for pl.Buffered(1) single-buffering of grid-invariant params.
_SINGLE_BUFFER_CONSTS = [True]


def attention_lbsa_sigmoid(x, weight, bias, context, mask=None, *,
                           compute_dtype=jnp.bfloat16):
    """x: (B, S, F), weight: (F, F), bias: (F,) or None, context: (F, 1),
    mask: (B, S) or None.

    Returns (weighted_sum (B, F) in x.dtype, attention weights (B, S) in f32).
    compute_dtype controls the x/weight DMA + MXU dtype (bf16 default,
    accumulation always f32); pass jnp.float32 for bit-accurate math."""
    B, S, F = x.shape
    out_dtype = x.dtype
    has_mask = mask is not None
    if bias is None:
        bias = jnp.zeros((F,), jnp.float32)
    if compute_dtype is None:
        compute_dtype = x.dtype

    x_bytes = jnp.dtype(compute_dtype).itemsize
    out_bytes = jnp.dtype(out_dtype).itemsize

    # Pad S to a sublane multiple so in-kernel reshapes stay layout no-ops.
    # Padded steps have x == 0, so they contribute 0 to the weighted sum; their
    # attention weights are sliced off below.
    S_pad = _round_up(S, 8)
    vmem_cap = _vmem_capacity_bytes()
    TB = _choose_batch_tile(B, S_pad, F, x_bytes, vmem_cap)
    B_pad = _round_up(B, TB)
    G = B_pad // TB

    x_in = x.astype(compute_dtype)
    if S_pad != S or B_pad != B:
        x_in = jnp.pad(x_in, ((0, B_pad - B), (0, S_pad - S), (0, 0)))
    w_in = weight.astype(compute_dtype)
    b_in = bias.astype(jnp.float32).reshape(1, F)
    c_in = context.astype(jnp.float32).reshape(1, F)
    inputs = [x_in, w_in, b_in, c_in]
    if has_mask:
        m_in = mask.astype(jnp.float32)
        if S_pad != S or B_pad != B:
            m_in = jnp.pad(m_in, ((0, B_pad - B), (0, S_pad - S)))
        inputs.append(m_in)

    # Advisory cost estimate with the actual element sizes.
    cost = pl.CostEstimate(
        flops=2 * B_pad * S_pad * F * F + 6 * B_pad * S_pad * F,
        transcendentals=B_pad * S_pad * (F + 1),
        bytes_accessed=(B_pad * S_pad * F * x_bytes + F * F * x_bytes + 2 * 4 * F
                        + B_pad * F * out_bytes + B_pad * S_pad * 4
                        + (B_pad * S_pad * 4 if has_mask else 0)),
    )

    # Per-step VMEM need: double-buffered x/output blocks, resident params,
    # f32 temporaries; cap at 75% of the per-chip VMEM capacity.
    need = (2 * TB * S_pad * F * x_bytes
            + F * F * x_bytes + 2 * 4 * F
            + 2 * (TB * F * out_bytes + TB * S_pad * 4)
            + 3 * TB * S_pad * F * 4
            + (2 * TB * S_pad * 4 if has_mask else 0))
    vmem_limit = int(max(min(int(0.75 * vmem_cap), max(2 * need, 16 * 2**20)),
                         need + (1 << 20)))

    kernel = functools.partial(_attn_lbsa_sigmoid_kernel, has_mask=has_mask)

    def make_call(single_buffer_consts):
        const_kw = dict(pipeline_mode=pl.Buffered(1)) if single_buffer_consts else {}
        in_specs = [
            pl.BlockSpec((TB, S_pad, F), lambda i: (i, 0, 0)),       # x (batch tile)
            pl.BlockSpec((F, F), lambda i: (0, 0), **const_kw),       # weight
            pl.BlockSpec((1, F), lambda i: (0, 0), **const_kw),       # bias
            pl.BlockSpec((1, F), lambda i: (0, 0), **const_kw),       # context (row)
        ]
        if has_mask:
            in_specs.append(pl.BlockSpec((TB, S_pad), lambda i: (i, 0)))  # mask
        out_specs = [
            pl.BlockSpec((TB, F), lambda i: (i, 0)),                  # weighted sum
            pl.BlockSpec((TB, S_pad), lambda i: (i, 0)),              # attention (f32)
        ]
        return pl.pallas_call(
            kernel,
            out_shape=(
                jax.ShapeDtypeStruct((B_pad, F), out_dtype),
                jax.ShapeDtypeStruct((B_pad, S_pad), jnp.float32),
            ),
            grid_spec=pltpu.PrefetchScalarGridSpec(
                num_scalar_prefetch=0,
                grid=(G,),
                in_specs=in_specs,
                out_specs=out_specs,
            ),
            compiler_params=pltpu.CompilerParams(
                dimension_semantics=("parallel",),
                vmem_limit_bytes=vmem_limit,
            ),
            cost_estimate=cost,
        )

    if _SINGLE_BUFFER_CONSTS[0]:
        try:
            out, a = make_call(True)(*inputs)
        except Exception:
            _SINGLE_BUFFER_CONSTS[0] = False
            out, a = make_call(False)(*inputs)
    else:
        out, a = make_call(False)(*inputs)

    return out[:B], a[:B, :S]


def _reference(x, weight, bias, context, mask):
    B, S, F = x.shape
    temp = x.astype(jnp.float32).reshape(-1, F)
    eij = jnp.tanh(temp @ weight.astype(jnp.float32) + bias.astype(jnp.float32))
    eij = (eij @ context.astype(jnp.float32)).reshape(B, S)
    a = jax.nn.sigmoid(eij)
    if mask is not None:
        a = a * mask.astype(jnp.float32)
    weighted = x.astype(jnp.float32) * a[..., None]
    return jnp.sum(weighted, axis=1).astype(x.dtype), a


def _xavier_uniform(key, shape):
    # PyTorch xavier_uniform_ for 2D: bound = sqrt(6 / (fan_in + fan_out)).
    fan_out, fan_in = shape
    bound = math.sqrt(6.0 / (fan_in + fan_out))
    return jax.random.uniform(key, shape, jnp.float32, -bound, bound)


if __name__ == "__main__":
    B, S, F = 2, 8, 32   # batch, step_dim, feature_dim

    key = jax.random.PRNGKey(0)
    kx, kw, kc, km = jax.random.split(key, 4)

    x = jax.random.normal(kx, (B, S, F), dtype=jnp.float32)
    weight = _xavier_uniform(kw, (F, F))
    context = _xavier_uniform(kc, (F, 1))
    bias = jnp.zeros((F,), dtype=jnp.float32)
    mask = (jax.random.uniform(km, (B, S)) > 0.3).astype(jnp.float32)

    ref_out, ref_a = _reference(x, weight, bias, context, mask)

    # 1) f32 MXU path: bit-level validation against the reference.
    out, a = attention_lbsa_sigmoid(x, weight, bias, context, mask,
                                    compute_dtype=jnp.float32)
    out = jax.block_until_ready(out)
    a = jax.block_until_ready(a)
    assert jnp.allclose(out, ref_out, atol=1e-5, rtol=1e-5), "f32 out mismatch"
    assert jnp.allclose(a, ref_a, atol=1e-5, rtol=1e-5), "f32 attention mismatch"

    # 2) default bf16 MXU/DMA path (f32 accumulation): looser tolerance.
    out_bf, a_bf = attention_lbsa_sigmoid(x, weight, bias, context, mask)
    out_bf = jax.block_until_ready(out_bf)
    a_bf = jax.block_until_ready(a_bf)
    assert jnp.allclose(out_bf, ref_out, atol=1e-1, rtol=1e-1), "bf16 out mismatch"
    assert jnp.allclose(a_bf, ref_a, atol=5e-2, rtol=5e-2), "bf16 attention mismatch"

    # 3) static no-mask kernel variant.
    ref_out_nm, ref_a_nm = _reference(x, weight, bias, context, None)
    out_nm, a_nm = attention_lbsa_sigmoid(x, weight, bias, context, None,
                                          compute_dtype=jnp.float32)
    out_nm = jax.block_until_ready(out_nm)
    assert jnp.allclose(out_nm, ref_out_nm, atol=1e-5, rtol=1e-5), "no-mask out mismatch"
    assert jnp.allclose(a_nm, ref_a_nm, atol=1e-5, rtol=1e-5), "no-mask attention mismatch"

    # 4) B/S padding + multi-step grid path (B=20, S=7 not tile multiples).
    B2, S2 = 20, 7
    kx2, km2 = jax.random.split(jax.random.PRNGKey(1), 2)
    x2 = jax.random.normal(kx2, (B2, S2, F), dtype=jnp.float32)
    mask2 = (jax.random.uniform(km2, (B2, S2)) > 0.3).astype(jnp.float32)
    ref_out2, ref_a2 = _reference(x2, weight, bias, context, mask2)
    out2, a2 = attention_lbsa_sigmoid(x2, weight, bias, context, mask2,
                                      compute_dtype=jnp.float32)
    out2 = jax.block_until_ready(out2)
    assert jnp.allclose(out2, ref_out2, atol=1e-5, rtol=1e-5), "padded out mismatch"
    assert jnp.allclose(a2, ref_a2, atol=1e-5, rtol=1e-5), "padded attention mismatch"

    print("KERNEL_OK")
</pallas_src>

<mosaic_0001>
module attributes {stable_mosaic.version = 11 : i64} {
  func.func @_attn_lbsa_sigmoid_kernel(%arg0: i32, %arg1: memref<2x8x32xf32, #tpu.memory_space<vmem>>, %arg2: memref<32x32xf32, #tpu.memory_space<vmem>>, %arg3: memref<1x32xf32, #tpu.memory_space<vmem>>, %arg4: memref<1x32xf32, #tpu.memory_space<vmem>>, %arg5: memref<2x8xf32, #tpu.memory_space<vmem>>, %arg6: memref<2x32xf32, #tpu.memory_space<vmem>>, %arg7: memref<2x8xf32, #tpu.memory_space<vmem>>) attributes {dimension_semantics = [#tpu.dimension_semantics<parallel>], iteration_bounds = array<i64: 1>, scalar_prefetch = 0 : i64, scratch_operands = 0 : i64, tpu.core_type = #tpu.core_type<tc>, window_params = [{transform_indices = @transform_0, window_bounds = array<i64: 2, 8, 32>}, {pipeline_mode = #tpu.pipeline_mode<synchronous>, transform_indices = @transform_1, window_bounds = array<i64: 32, 32>}, {pipeline_mode = #tpu.pipeline_mode<synchronous>, transform_indices = @transform_2, window_bounds = array<i64: 1, 32>}, {pipeline_mode = #tpu.pipeline_mode<synchronous>, transform_indices = @transform_3, window_bounds = array<i64: 1, 32>}, {transform_indices = @transform_4, window_bounds = array<i64: 2, 8>}, {transform_indices = @transform_5, window_bounds = array<i64: 2, 32>}, {transform_indices = @transform_6, window_bounds = array<i64: 2, 8>}]} {
    %c0 = arith.constant 0 : index
    %c0_0 = arith.constant 0 : index
    %c0_1 = arith.constant 0 : index
    %0 = vector.load %arg1[%c0, %c0_0, %c0_1] : memref<2x8x32xf32, #tpu.memory_space<vmem>>, vector<2x8x32xf32>
    %1 = vector.shape_cast %0 : vector<2x8x32xf32> to vector<16x32xf32>
    %c0_2 = arith.constant 0 : index
    %c0_3 = arith.constant 0 : index
    %2 = vector.load %arg2[%c0_2, %c0_3] : memref<32x32xf32, #tpu.memory_space<vmem>>, vector<32x32xf32>
    %cst = arith.constant dense<0.000000e+00> : vector<16x32xf32>
    %3 = tpu.matmul %1, %2, %cst {dimension_numbers = #tpu.dot_dimension_numbers<[1], [0], [0], [1], [0, 0, 1, 1], [], []>} : vector<16x32xf32>, vector<32x32xf32>, vector<16x32xf32> -> vector<16x32xf32>
    %c0_4 = arith.constant 0 : index
    %c0_5 = arith.constant 0 : index
    %4 = vector.load %arg3[%c0_4, %c0_5] : memref<1x32xf32, #tpu.memory_space<vmem>>, vector<1x32xf32>
    %5 = vector.broadcast %4 : vector<1x32xf32> to vector<16x32xf32>
    %6 = arith.addf %3, %5 : vector<16x32xf32>
    %7 = math.tanh %6 : vector<16x32xf32>
    %c0_6 = arith.constant 0 : index
    %c0_7 = arith.constant 0 : index
    %8 = vector.load %arg4[%c0_6, %c0_7] : memref<1x32xf32, #tpu.memory_space<vmem>>, vector<1x32xf32>
    %9 = vector.broadcast %8 : vector<1x32xf32> to vector<16x32xf32>
    %10 = arith.mulf %7, %9 : vector<16x32xf32>
    %cst_8 = arith.constant dense<0.000000e+00> : vector<16xf32>
    %11 = vector.multi_reduction <add>, %10, %cst_8 [1] : vector<16x32xf32> to vector<16xf32>
    %12 = vector.shape_cast %11 : vector<16xf32> to vector<16x1xf32>
    %13 = arith.negf %12 : vector<16x1xf32>
    %14 = math.exp %13 : vector<16x1xf32>
    %cst_9 = arith.constant 1.000000e+00 : f32
    %15 = vector.broadcast %cst_9 : f32 to vector<16x1xf32>
    %16 = arith.addf %15, %14 : vector<16x1xf32>
    %17 = arith.divf %15, %16 : vector<16x1xf32>
    %18 = vector.shape_cast %17 : vector<16x1xf32> to vector<2x8x1xf32>
    %c0_10 = arith.constant 0 : index
    %c0_11 = arith.constant 0 : index
    %19 = vector.load %arg5[%c0_10, %c0_11] : memref<2x8xf32, #tpu.memory_space<vmem>>, vector<2x8xf32>
    %20 = vector.shape_cast %19 : vector<2x8xf32> to vector<2x8x1xf32>
    %21 = arith.mulf %18, %20 : vector<2x8x1xf32>
    %22 = vector.shape_cast %21 : vector<2x8x1xf32> to vector<2x8xf32>
    %c0_12 = arith.constant 0 : index
    %c0_13 = arith.constant 0 : index
    %23 = vector.load %arg7[%c0_12, %c0_13] : memref<2x8xf32, #tpu.memory_space<vmem>>, vector<2x8xf32>
    tpu.vector_store %arg7[%c0_12, %c0_13], %22 {strides = array<i32>} : memref<2x8xf32, #tpu.memory_space<vmem>>, vector<2x8xf32>,
    %24 = vector.broadcast %21 : vector<2x8x1xf32> to vector<2x8x32xf32>
    %25 = arith.mulf %0, %24 : vector<2x8x32xf32>
    %cst_14 = arith.constant dense<0.000000e+00> : vector<2x32xf32>
    %26 = vector.multi_reduction <add>, %25, %cst_14 [1] : vector<2x8x32xf32> to vector<2x32xf32>
    %c0_15 = arith.constant 0 : index
    %c0_16 = arith.constant 0 : index
    %27 = vector.load %arg6[%c0_15, %c0_16] : memref<2x32xf32, #tpu.memory_space<vmem>>, vector<2x32xf32>
    tpu.vector_store %arg6[%c0_15, %c0_16], %26 {strides = array<i32>} : memref<2x32xf32, #tpu.memory_space<vmem>>, vector<2x32xf32>,
    return
  }
  func.func @transform_0(%arg0: i32) -> (i32, i32, i32) {
    %c0_i32 = arith.constant 0 : i32
    %c0_i32_0 = arith.constant 0 : i32
    %c0_i32_1 = arith.constant 0 : i32
    return %arg0, %c0_i32, %c0_i32_0 : i32, i32, i32
  }
  func.func @transform_1(%arg0: i32) -> (i32, i32) {
    %c0_i32 = arith.constant 0 : i32
    %c0_i32_0 = arith.constant 0 : i32
    %c0_i32_1 = arith.constant 0 : i32
    return %c0_i32, %c0_i32_0 : i32, i32
  }
  func.func @transform_2(%arg0: i32) -> (i32, i32) {
    %c0_i32 = arith.constant 0 : i32
    %c0_i32_0 = arith.constant 0 : i32
    %c0_i32_1 = arith.constant 0 : i32
    return %c0_i32, %c0_i32_0 : i32, i32
  }
  func.func @transform_3(%arg0: i32) -> (i32, i32) {
    %c0_i32 = arith.constant 0 : i32
    %c0_i32_0 = arith.constant 0 : i32
    %c0_i32_1 = arith.constant 0 : i32
    return %c0_i32, %c0_i32_0 : i32, i32
  }
  func.func @transform_4(%arg0: i32) -> (i32, i32) {
    %c0_i32 = arith.constant 0 : i32
    %c0_i32_0 = arith.constant 0 : i32
    return %arg0, %c0_i32 : i32, i32
  }
  func.func @transform_5(%arg0: i32) -> (i32, i32) {
    %c0_i32 = arith.constant 0 : i32
    %c0_i32_0 = arith.constant 0 : i32
    return %arg0, %c0_i32 : i32, i32
  }
  func.func @transform_6(%arg0: i32) -> (i32, i32) {
    %c0_i32 = arith.constant 0 : i32
    %c0_i32_0 = arith.constant 0 : i32
    return %arg0, %c0_i32 : i32, i32
  }
}

module attributes {stable_mosaic.version = 11 : i64} {
  func.func @_attn_lbsa_sigmoid_kernel(%arg0: i32, %arg1: memref<2x8x32xf32, #tpu.memory_space<vmem>>, %arg2: memref<32x32xf32, #tpu.memory_space<vmem>>, %arg3: memref<1x32xf32, #tpu.memory_space<vmem>>, %arg4: memref<1x32xf32, #tpu.memory_space<vmem>>, %arg5: memref<2x8xf32, #tpu.memory_space<vmem>>, %arg6: memref<2x32xf32, #tpu.memory_space<vmem>>, %arg7: memref<2x8xf32, #tpu.memory_space<vmem>>) attributes {dimension_semantics = [#tpu.dimension_semantics<parallel>], iteration_bounds = array<i64: 1>, scalar_prefetch = 0 : i64, scratch_operands = 0 : i64, tpu.core_type = #tpu.core_type<tc>, window_params = [{transform_indices = @transform_0, window_bounds = array<i64: 2, 8, 32>}, {pipeline_mode = #tpu.pipeline_mode<synchronous>, transform_indices = @transform_1, window_bounds = array<i64: 32, 32>}, {pipeline_mode = #tpu.pipeline_mode<synchronous>, transform_indices = @transform_2, window_bounds = array<i64: 1, 32>}, {pipeline_mode = #tpu.pipeline_mode<synchronous>, transform_indices = @transform_3, window_bounds = array<i64: 1, 32>}, {transform_indices = @transform_4, window_bounds = array<i64: 2, 8>}, {transform_indices = @transform_5, window_bounds = array<i64: 2, 32>}, {transform_indices = @transform_6, window_bounds = array<i64: 2, 8>}]} {
    %c0 = arith.constant 0 : index
    %c0_0 = arith.constant 0 : index
    %c0_1 = arith.constant 0 : index
    %0 = vector.load %arg1[%c0, %c0_0, %c0_1] : memref<2x8x32xf32, #tpu.memory_space<vmem>>, vector<2x8x32xf32>
    %1 = vector.shape_cast %0 : vector<2x8x32xf32> to vector<16x32xf32>
    %c0_2 = arith.constant 0 : index
    %c0_3 = arith.constant 0 : index
    %2 = vector.load %arg2[%c0_2, %c0_3] : memref<32x32xf32, #tpu.memory_space<vmem>>, vector<32x32xf32>
    %cst = arith.constant dense<0.000000e+00> : vector<16x32xf32>
    %3 = tpu.matmul %1, %2, %cst {dimension_numbers = #tpu.dot_dimension_numbers<[1], [0], [0], [1], [0, 0, 1, 1], [], []>} : vector<16x32xf32>, vector<32x32xf32>, vector<16x32xf32> -> vector<16x32xf32>
    %c0_4 = arith.constant 0 : index
    %c0_5 = arith.constant 0 : index
    %4 = vector.load %arg3[%c0_4, %c0_5] : memref<1x32xf32, #tpu.memory_space<vmem>>, vector<1x32xf32>
    %5 = vector.broadcast %4 : vector<1x32xf32> to vector<16x32xf32>
    %6 = arith.addf %3, %5 : vector<16x32xf32>
    %7 = math.tanh %6 : vector<16x32xf32>
    %c0_6 = arith.constant 0 : index
    %c0_7 = arith.constant 0 : index
    %8 = vector.load %arg4[%c0_6, %c0_7] : memref<1x32xf32, #tpu.memory_space<vmem>>, vector<1x32xf32>
    %9 = vector.broadcast %8 : vector<1x32xf32> to vector<16x32xf32>
    %10 = arith.mulf %7, %9 : vector<16x32xf32>
    %cst_8 = arith.constant dense<0.000000e+00> : vector<16xf32>
    %11 = vector.multi_reduction <add>, %10, %cst_8 [1] : vector<16x32xf32> to vector<16xf32>
    %12 = vector.shape_cast %11 : vector<16xf32> to vector<16x1xf32>
    %13 = arith.negf %12 : vector<16x1xf32>
    %14 = math.exp %13 : vector<16x1xf32>
    %cst_9 = arith.constant 1.000000e+00 : f32
    %15 = vector.broadcast %cst_9 : f32 to vector<16x1xf32>
    %16 = arith.addf %15, %14 : vector<16x1xf32>
    %17 = arith.divf %15, %16 : vector<16x1xf32>
    %18 = vector.shape_cast %17 : vector<16x1xf32> to vector<2x8x1xf32>
    %c0_10 = arith.constant 0 : index
    %c0_11 = arith.constant 0 : index
    %19 = vector.load %arg5[%c0_10, %c0_11] : memref<2x8xf32, #tpu.memory_space<vmem>>, vector<2x8xf32>
    %20 = vector.shape_cast %19 : vector<2x8xf32> to vector<2x8x1xf32>
    %21 = arith.mulf %18, %20 : vector<2x8x1xf32>
    %22 = vector.shape_cast %21 : vector<2x8x1xf32> to vector<2x8xf32>
    %c0_12 = arith.constant 0 : index
    %c0_13 = arith.constant 0 : index
    %23 = vector.load %arg7[%c0_12, %c0_13] : memref<2x8xf32, #tpu.memory_space<vmem>>, vector<2x8xf32>
    tpu.vector_store %arg7[%c0_12, %c0_13], %22 {strides = array<i32>} : memref<2x8xf32, #tpu.memory_space<vmem>>, vector<2x8xf32>,
    %24 = vector.broadcast %21 : vector<2x8x1xf32> to vector<2x8x32xf32>
    %25 = arith.mulf %0, %24 : vector<2x8x32xf32>
    %cst_14 = arith.constant dense<0.000000e+00> : vector<2x32xf32>
    %26 = vector.multi_reduction <add>, %25, %cst_14 [1] : vector<2x8x32xf32> to vector<2x32xf32>
    %c0_15 = arith.constant 0 : index
    %c0_16 = arith.constant 0 : index
    %27 = vector.load %arg6[%c0_15, %c0_16] : memref<2x32xf32, #tpu.memory_space<vmem>>, vector<2x32xf32>
    tpu.vector_store %arg6[%c0_15, %c0_16], %26 {strides = array<i32>} : memref<2x32xf32, #tpu.memory_space<vmem>>, vector<2x32xf32>,
    return
  }
  func.func @transform_0(%arg0: i32) -> (i32, i32, i32) {
    %c0_i32 = arith.constant 0 : i32
    %c0_i32_0 = arith.constant 0 : i32
    %c0_i32_1 = arith.constant 0 : i32
    return %arg0, %c0_i32, %c0_i32_0 : i32, i32, i32
  }
  func.func @transform_1(%arg0: i32) -> (i32, i32) {
    %c0_i32 = arith.constant 0 : i32
    %c0_i32_0 = arith.constant 0 : i32
    %c0_i32_1 = arith.constant 0 : i32
    return %c0_i32, %c0_i32_0 : i32, i32
  }
  func.func @transform_2(%arg0: i32) -> (i32, i32) {
    %c0_i32 = arith.constant 0 : i32
    %c0_i32_0 = arith.constant 0 : i32
    %c0_i32_1 = arith.constant 0 : i32
    return %c0_i32, %c0_i32_0 : i32, i32
  }
  func.func @transform_3(%arg0: i32) -> (i32, i32) {
    %c0_i32 = arith.constant 0 : i32
    %c0_i32_0 = arith.constant 0 : i32
    %c0_i32_1 = arith.constant 0 : i32
    return %c0_i32, %c0_i32_0 : i32, i32
  }
  func.func @transform_4(%arg0: i32) -> (i32, i32) {
    %c0_i32 = arith.constant 0 : i32
    %c0_i32_0 = arith.constant 0 : i32
    return %arg0, %c0_i32 : i32, i32
  }
  func.func @transform_5(%arg0: i32) -> (i32, i32) {
    %c0_i32 = arith.constant 0 : i32
    %c0_i32_0 = arith.constant 0 : i32
    return %arg0, %c0_i32 : i32, i32
  }
  func.func @transform_6(%arg0: i32) -> (i32, i32) {
    %c0_i32 = arith.constant 0 : i32
    %c0_i32_0 = arith.constant 0 : i32
    return %arg0, %c0_i32 : i32, i32
  }
}

</mosaic_0001>

<bundles_post_ra>
// kernel: tpu_custom_call.1
= control target key start
LH: loop header
LB: loop body
LE: loop exit
PB: predicated region body
PF: predicated region fallthrough
CT: control target
= control target key end

     0   :  { %12 = vsyncpa [#allocation3], 0  ;;  %s461_s0 = inlined_call_operand.hbm [shape: f32[2,8,32], index: 0, kind: input, shape index: {}]   ;;  %s462_s1 = inlined_call_operand.hbm [shape: f32[32,32], index: 1, kind: input, shape index: {}]   ;;  %s463_s2 = inlined_call_operand.vmem [shape: f32[1,32], index: 2, kind: input, shape index: {}]   ;;  %s464_s3 = inlined_call_operand.vmem [shape: f32[1,32], index: 3, kind: input, shape index: {}]   ;;  %s465_s4 = inlined_call_operand.vmem [shape: f32[2,8], index: 4, kind: input, shape index: {}]   ;;  %s466_s5 = inlined_call_operand.hbm [shape: f32[2,32], index: 5, kind: output, shape index: {0}]   ;;  %s467_s6 = inlined_call_operand.hbm [shape: f32[2,8], index: 6, kind: output, shape index: {1}]  }
   0x1   :  { %13 = vsyncpa [#allocation6], 0 }
   0x2   :  { %14 = vsyncpa [#allocation4], 0 }
   0x3   :  { %15 = vsyncpa [#allocation9], 0  ;;  %s391_s21 = smov [#allocation2]  }
   0x4   :  { %s21_s22 = sshll.u32 %s391_s21, 4  ;;  %s22_s22 = int_to_ptr.vmem [resolvable:$true] %s21_s22 }
   0x5   :  { %s311_s23 = scalar_lea.vmem %s22_s22, 256  ;;  %p316_p1 = scmp.lt.s32.totalorder %s22_s22, %s22_s22 }
   0x6   :  { %p312_p0 = scmp.ne.s32.totalorder %s22_s22, %s311_s23  ;;  %p317_p2 = scmp.lt.s32.totalorder %s311_s23, %s311_s23 }
   0x8   :  { %p318_p3 = por %p317_p2, %p316_p1 }
   0xa   :  { %p319_p4 = pnand %p318_p3, %p312_p0 }
   0xc   :  { %322 = shalt.err (!%p319_p4)
}
   0xd   :  { %s392_s24 = smov 128   ;;  %s393_s25 = smov 8  }
   0xe   :  { %27 = dma.hbm_to_vmem [thread:$0]  %s461_s0, 256, %s22_s22, [#allocation3], %s392_s24, %s392_s24, %s393_s25  }
   0xf   :  { %s394_s28 = smov [#allocation5]  }
  0x10   :  { %s33_s29 = sshll.u32 %s394_s28, 4  ;;  %s34_s29 = int_to_ptr.vmem [resolvable:$true] %s33_s29 }
  0x11   :  { %s331_s30 = scalar_lea.vmem %s34_s29, 512  ;;  %p336_p6 = scmp.lt.s32.totalorder %s34_s29, %s34_s29 }
  0x12   :  { %p332_p5 = scmp.ne.s32.totalorder %s34_s29, %s331_s30  ;;  %p337_p7 = scmp.lt.s32.totalorder %s331_s30, %s331_s30 }
  0x14   :  { %p338_p8 = por %p337_p7, %p336_p6 }
  0x16   :  { %p339_p9 = pnand %p338_p8, %p332_p5 }
  0x18   :  { %342 = shalt.err (!%p339_p9)
}
  0x19   :  { %39 = dma.hbm_to_vmem [thread:$0]  %s462_s1, 512, %s34_s29, [#allocation6], %s392_s24, %s392_s24, %s393_s25  }
  0x1a   :  { %383 = dma.done.wait [#allocation3], 256  }
  0x1b   :  { %384 = vsyncadd [#allocation3], 4294967040 }
  0x1c   :  { %385 = dma.done.wait [#allocation6], 512  }
  0x1d   :  { %386 = vsyncadd [#allocation6], 4294966784  ;;  %vm65_vm0 = vcmask 261120   ;;  %v57_v0 = vld [vmem:[#allocation5 + $0x18] sm:$0xff]  ;;  %v56_v1 = vld [vmem:[#allocation5 + $0x10] sm:$0xff]  ;;  %v177_v6 = vlaneseq  ;;  %vm205_vm1 = vcmask 1041409  }
  0x1e   :  { %274 = vmatprep.subr.mxu0 %v57_v0  ;;  %v52_v2 = vld [vmem:[#allocation2] sm:$0xff]  ;;  %v55_v3 = vld [vmem:[#allocation5 + $0x8] sm:$0xff]  ;;  %v54_v4 = vld [vmem:[#allocation5] sm:$0xff]  ;;  %vm208_vm2 = vcmask 58368  }
  0x1f   :  { %275 = vmatpush3.msra.mxu0 %v57_v0  ;;  %282 = vmatprep.mubr.msk.f32.mxu0 %vm65_vm0, %v52_v2  ;;  %v53_v5 = vld [vmem:[#allocation2 + $0x8] sm:$0xff]  ;;  %v178_v7 = vshrl.u32 %v177_v6, 7  ;;  %v176_v8 = vld [vmem:[%s465_s4] sm:$0x3]  ;;  %v196_v34 = vand.u32 127, %v177_v6 }
  0x20   :  { %276 = vmatprep.subr.mxu0 %v56_v1  ;;  %v262_v13 = vld [vmem:[%s463_s2] ss:$0 sm:$0xff]  ;;  %s395_s2 = smov [#allocation8]  }
  0x21   :  { %277 = vmatpush3.msra.mxu0 %v56_v1  ;;  %v179_v9 = vsub.s32 0, %v178_v7  ;;  %v186_v10 = vsub.s32 1, %v178_v7  ;;  %v265_v20 = vld [vmem:[%s464_s3] ss:$0 sm:$0xff]  ;;  %v199_v38 = vsub.s32 %v196_v34, %v178_v7  ;;  %s248_s3 = sshll.u32 %s395_s2, 4  ;;  %s249_s3 = int_to_ptr.vmem [resolvable:$true] %s248_s3 }
  0x22   :  { %278 = vmatprep.subr.mxu0 %v55_v3  ;;  %s343_s12 = scalar_lea.vmem %s249_s3, 32  ;;  %p348_p11 = scmp.lt.s32.totalorder %s249_s3, %s249_s3 }
  0x23   :  { %279 = vmatpush3.msra.mxu0 %v55_v3  ;;  %v180_v11 = vrot.slane %v176_v8, %v179_v9  ;;  %v187_v12 = vrot.slane %v176_v8, %v186_v10  ;;  %p344_p10 = scmp.ne.s32.totalorder %s249_s3, %s343_s12  ;;  %p349_p12 = scmp.lt.s32.totalorder %s343_s12, %s343_s12 }
  0x24   :  { %280 = vmatprep.subr.mxu0 %v54_v4 }
  0x25   :  { %281 = vmatpush3.msra.mxu0 %v54_v4  ;;  %182 = vbcast.lane.b32.xlu1 %v180_v11, 256  ;;  %p350_p13 = por %p349_p12, %p348_p11 }
  0x26   :  { %283 = vmatmul.mubr.msk.f32.vlgmr.msra.gmra.mxu0 %vm65_vm0, %v53_v5 }
  0x27   :  { %p351_p0 = pnand %p350_p13, %p344_p10 }
  0x29   :  { %189 = vbcast.lane.b32.xlu1 %v187_v12, 256 }
  0x97   :  { %v183_v33 = vpop.permute.xlu1 %182 }
  0x9b   :  { %v190_v37 = vpop.permute.xlu1 %189 }
  0xe6   :  { %v284_v14 = vpop.f32.mrf.mxu0 }
  0xe7   :  { %v144_v15 = vadd.f32 %v284_v14, %v262_v13 }
  0xe8   :  { %v138_v16 = vpop.f32.mrf.mxu0 }
  0xe9   :  { %v139_v17 = vadd.f32 %v262_v13, %v138_v16  ;;  %291 = vtanh.f32 %v144_v15 }
  0xeb   :  { %293 = vtanh.f32 %v139_v17 }
  0xf6   :  { %v292_v18 = vpop.eup %291 }
  0xf7   :  { %v157_v23 = vmul.f32 %v292_v18, %v265_v20 }
  0xf8   :  { %v294_v19 = vpop.eup %293 }
  0xf9   :  { %v156_v21 = vmul.f32 %v294_v19, %v265_v20  ;;  %v161_v24 = vsel %vm65_vm0, %v157_v23, 0.0 }
  0xfb   :  { %v158_v22 = vsel %vm65_vm0, %v156_v21, 0.0 }
  0xfc   :  { %159 = vadd.xlane.f32.xlu0 %v158_v22 }
 0x100   :  { %162 = vadd.xlane.f32.xlu0 %v161_v24 }
 0x185   :  { %v160_v25 = vpop.xlane.xlu0 %159 }
 0x186   :  { %v266_v26 = vmul.f32 -1.442695, %v160_v25 }
 0x188   :  { %295 = vpow2.f32 %v266_v26 }
 0x189   :  { %v163_v27 = vpop.xlane.xlu0 %162 }
 0x18a   :  { %v267_v28 = vmul.f32 -1.442695, %v163_v27 }
 0x18c   :  { %297 = vpow2.f32 %v267_v28 }
 0x195   :  { %v296_v29 = vpop.eup %295 }
 0x196   :  { %v170_v30 = vadd.f32 1.0, %v296_v29 }
 0x198   :  { %299 = vrcp.f32 %v170_v30 }
 0x199   :  { %v298_v31 = vpop.eup %297 }
 0x19a   :  { %v171_v32 = vadd.f32 1.0, %v298_v31 }
 0x19c   :  { %301 = vrcp.f32 %v171_v32 }
 0x1a5   :  { %v300_v35 = vpop.eup %299 }
 0x1a6   :  { %v191_v36 = vmul.f32 %v300_v35, %v183_v33 }
 0x1a8   :  { %v210_v39 = vmul.f32 %v191_v36, %v52_v2  ;;  %v200_v44 = vrot.slane %v191_v36, %v199_v38 }
 0x1a9   :  { %v302_v40 = vpop.eup %301 }
 0x1aa   :  { %v212_v41 = vsel %vm65_vm0, %v210_v39, 0.0  ;;  %v192_v42 = vmul.f32 %v302_v40, %v190_v37 }
 0x1ab   :  { %v213_v43 = vrot.slane %v212_v41, 4 }
 0x1ac   :  { %v204_v45 = vrot.slane %v192_v42, %v199_v38  ;;  %v211_v46 = vmul.f32 %v192_v42, %v53_v5 }
 0x1ad   :  { %v214_v47 = vadd.f32 %v213_v43, %v212_v41 }
 0x1ae   :  { %v219_v48 = vsel %vm65_vm0, %v211_v46, 0.0  ;;  %v206_v49 = vsel %vm205_vm1, %v204_v45, %v200_v44 }
 0x1af   :  { %v215_v50 = vrot.slane %v214_v47, 2  ;;  %v220_v51 = vrot.slane %v219_v48, 4  ;;  %209 = vst.msk [vmem:[#allocation8] sm:$0x3] %vm208_vm2, %v206_v49 }
 0x1b0   :  { %354 = shalt.err (!%p351_p0)
}
 0x1b1   :  { %251 = dma.vmem_to_hbm [thread:$0]  %s249_s3, 32, %s467_s6, [#allocation9]   ;;  %v216_v52 = vadd.f32 %v215_v50, %v214_v47  ;;  %v221_v53 = vadd.f32 %v220_v51, %v219_v48  ;;  %vm230_vm3 = vcmask 254976  }
 0x1b2   :  { %s396_s15 = smov [#allocation7]  }
 0x1b3   :  { %v222_v54 = vrot.slane %v221_v53, 2  ;;  %v217_v55 = vrot.slane %v216_v52, 1  ;;  %s238_s16 = sshll.u32 %s396_s15, 4  ;;  %s239_s16 = int_to_ptr.vmem [resolvable:$true] %s238_s16 }
 0x1b4   :  { %s363_s17 = scalar_lea.vmem %s239_s16, 32  ;;  %p368_p2 = scmp.lt.s32.totalorder %s239_s16, %s239_s16 }
 0x1b5   :  { %v223_v56 = vadd.f32 %v222_v54, %v221_v53  ;;  %v218_v58 = vadd.f32 %v217_v55, %v216_v52  ;;  %p364_p1 = scmp.ne.s32.totalorder %s239_s16, %s363_s17  ;;  %p369_p3 = scmp.lt.s32.totalorder %s363_s17, %s363_s17 }
 0x1b7   :  { %v224_v57 = vrot.slane %v223_v56, 1  ;;  %p370_p4 = por %p369_p3, %p368_p2 }
 0x1b9   :  { %v225_v59 = vadd.f32 %v224_v57, %v223_v56  ;;  %p371_p5 = pnand %p370_p4, %p364_p1 }
 0x1bb   :  { %v228_v60 = vsel %vm205_vm1, %v225_v59, %v218_v58 }
 0x1bc   :  { %231 = vst.msk [vmem:[#allocation7] sm:$0x3] %vm230_vm3, %v228_v60 }
 0x1bd   :  { %374 = shalt.err (!%p371_p5)
}
 0x1be   :  { %241 = dma.vmem_to_hbm [thread:$0]  %s239_s16, 32, %s466_s5, [#allocation4]  }
 0x1bf   :  { %387 = dma.done.wait [#allocation4], 32  }
 0x1c0   :  { %388 = vsyncadd [#allocation4], 4294967264 }
 0x1c1   :  { %389 = dma.done.wait [#allocation9], 32  }
 0x1c2   :  { %390 = vsyncadd [#allocation9], 4294967264 }
 0x1c3   :  { %258 = vsyncpa [#allocation3], 1 }
 0x1c4   :  { %259 = vsyncpa [#allocation6], 1 }
 0x1c5   :  { %260 = vsyncpa [#allocation4], 1 }
 0x1c6   :  { %261 = vsyncpa [#allocation9], 1 }

// kernel: tpu_custom_call.1
= control target key start
LH: loop header
LB: loop body
LE: loop exit
PB: predicated region body
PF: predicated region fallthrough
CT: control target
= control target key end

     0   :  { %12 = vsyncpa [#allocation3], 0  ;;  %s461_s0 = inlined_call_operand.hbm [shape: f32[2,8,32], index: 0, kind: input, shape index: {}]   ;;  %s462_s1 = inlined_call_operand.hbm [shape: f32[32,32], index: 1, kind: input, shape index: {}]   ;;  %s463_s2 = inlined_call_operand.vmem [shape: f32[1,32], index: 2, kind: input, shape index: {}]   ;;  %s464_s3 = inlined_call_operand.vmem [shape: f32[1,32], index: 3, kind: input, shape index: {}]   ;;  %s465_s4 = inlined_call_operand.vmem [shape: f32[2,8], index: 4, kind: input, shape index: {}]   ;;  %s466_s5 = inlined_call_operand.hbm [shape: f32[2,32], index: 5, kind: output, shape index: {0}]   ;;  %s467_s6 = inlined_call_operand.hbm [shape: f32[2,8], index: 6, kind: output, shape index: {1}]  }
   0x1   :  { %13 = vsyncpa [#allocation6], 0 }
   0x2   :  { %14 = vsyncpa [#allocation4], 0 }
   0x3   :  { %15 = vsyncpa [#allocation9], 0  ;;  %s391_s21 = smov [#allocation2]  }
   0x4   :  { %s21_s22 = sshll.u32 %s391_s21, 4  ;;  %s22_s22 = int_to_ptr.vmem [resolvable:$true] %s21_s22 }
   0x5   :  { %s311_s23 = scalar_lea.vmem %s22_s22, 256  ;;  %p316_p1 = scmp.lt.s32.totalorder %s22_s22, %s22_s22 }
   0x6   :  { %p312_p0 = scmp.ne.s32.totalorder %s22_s22, %s311_s23  ;;  %p317_p2 = scmp.lt.s32.totalorder %s311_s23, %s311_s23 }
   0x8   :  { %p318_p3 = por %p317_p2, %p316_p1 }
   0xa   :  { %p319_p4 = pnand %p318_p3, %p312_p0 }
   0xc   :  { %322 = shalt.err (!%p319_p4)
}
   0xd   :  { %s392_s24 = smov 128   ;;  %s393_s25 = smov 8  }
   0xe   :  { %27 = dma.hbm_to_vmem [thread:$0]  %s461_s0, 256, %s22_s22, [#allocation3], %s392_s24, %s392_s24, %s393_s25  }
   0xf   :  { %s394_s28 = smov [#allocation5]  }
  0x10   :  { %s33_s29 = sshll.u32 %s394_s28, 4  ;;  %s34_s29 = int_to_ptr.vmem [resolvable:$true] %s33_s29 }
  0x11   :  { %s331_s30 = scalar_lea.vmem %s34_s29, 512  ;;  %p336_p6 = scmp.lt.s32.totalorder %s34_s29, %s34_s29 }
  0x12   :  { %p332_p5 = scmp.ne.s32.totalorder %s34_s29, %s331_s30  ;;  %p337_p7 = scmp.lt.s32.totalorder %s331_s30, %s331_s30 }
  0x14   :  { %p338_p8 = por %p337_p7, %p336_p6 }
  0x16   :  { %p339_p9 = pnand %p338_p8, %p332_p5 }
  0x18   :  { %342 = shalt.err (!%p339_p9)
}
  0x19   :  { %39 = dma.hbm_to_vmem [thread:$0]  %s462_s1, 512, %s34_s29, [#allocation6], %s392_s24, %s392_s24, %s393_s25  }
  0x1a   :  { %383 = dma.done.wait [#allocation3], 256  }
  0x1b   :  { %384 = vsyncadd [#allocation3], 4294967040 }
  0x1c   :  { %385 = dma.done.wait [#allocation6], 512  }
  0x1d   :  { %386 = vsyncadd [#allocation6], 4294966784  ;;  %vm65_vm0 = vcmask 261120   ;;  %v57_v0 = vld [vmem:[#allocation5 + $0x18] sm:$0xff]  ;;  %v56_v1 = vld [vmem:[#allocation5 + $0x10] sm:$0xff]  ;;  %v177_v6 = vlaneseq  ;;  %vm205_vm1 = vcmask 1041409  }
  0x1e   :  { %274 = vmatprep.subr.mxu0 %v57_v0  ;;  %v52_v2 = vld [vmem:[#allocation2] sm:$0xff]  ;;  %v55_v3 = vld [vmem:[#allocation5 + $0x8] sm:$0xff]  ;;  %v54_v4 = vld [vmem:[#allocation5] sm:$0xff]  ;;  %vm208_vm2 = vcmask 58368  }
  0x1f   :  { %275 = vmatpush3.msra.mxu0 %v57_v0  ;;  %282 = vmatprep.mubr.msk.f32.mxu0 %vm65_vm0, %v52_v2  ;;  %v53_v5 = vld [vmem:[#allocation2 + $0x8] sm:$0xff]  ;;  %v178_v7 = vshrl.u32 %v177_v6, 7  ;;  %v176_v8 = vld [vmem:[%s465_s4] sm:$0x3]  ;;  %v196_v34 = vand.u32 127, %v177_v6 }
  0x20   :  { %276 = vmatprep.subr.mxu0 %v56_v1  ;;  %v262_v13 = vld [vmem:[%s463_s2] ss:$0 sm:$0xff]  ;;  %s395_s2 = smov [#allocation8]  }
  0x21   :  { %277 = vmatpush3.msra.mxu0 %v56_v1  ;;  %v179_v9 = vsub.s32 0, %v178_v7  ;;  %v186_v10 = vsub.s32 1, %v178_v7  ;;  %v265_v20 = vld [vmem:[%s464_s3] ss:$0 sm:$0xff]  ;;  %v199_v38 = vsub.s32 %v196_v34, %v178_v7  ;;  %s248_s3 = sshll.u32 %s395_s2, 4  ;;  %s249_s3 = int_to_ptr.vmem [resolvable:$true] %s248_s3 }
  0x22   :  { %278 = vmatprep.subr.mxu0 %v55_v3  ;;  %s343_s12 = scalar_lea.vmem %s249_s3, 32  ;;  %p348_p11 = scmp.lt.s32.totalorder %s249_s3, %s249_s3 }
  0x23   :  { %279 = vmatpush3.msra.mxu0 %v55_v3  ;;  %v180_v11 = vrot.slane %v176_v8, %v179_v9  ;;  %v187_v12 = vrot.slane %v176_v8, %v186_v10  ;;  %p344_p10 = scmp.ne.s32.totalorder %s249_s3, %s343_s12  ;;  %p349_p12 = scmp.lt.s32.totalorder %s343_s12, %s343_s12 }
  0x24   :  { %280 = vmatprep.subr.mxu0 %v54_v4 }
  0x25   :  { %281 = vmatpush3.msra.mxu0 %v54_v4  ;;  %182 = vbcast.lane.b32.xlu1 %v180_v11, 256  ;;  %p350_p13 = por %p349_p12, %p348_p11 }
  0x26   :  { %283 = vmatmul.mubr.msk.f32.vlgmr.msra.gmra.mxu0 %vm65_vm0, %v53_v5 }
  0x27   :  { %p351_p0 = pnand %p350_p13, %p344_p10 }
  0x29   :  { %189 = vbcast.lane.b32.xlu1 %v187_v12, 256 }
  0x97   :  { %v183_v33 = vpop.permute.xlu1 %182 }
  0x9b   :  { %v190_v37 = vpop.permute.xlu1 %189 }
  0xe6   :  { %v284_v14 = vpop.f32.mrf.mxu0 }
  0xe7   :  { %v144_v15 = vadd.f32 %v284_v14, %v262_v13 }
  0xe8   :  { %v138_v16 = vpop.f32.mrf.mxu0 }
  0xe9   :  { %v139_v17 = vadd.f32 %v262_v13, %v138_v16  ;;  %291 = vtanh.f32 %v144_v15 }
  0xeb   :  { %293 = vtanh.f32 %v139_v17 }
  0xf6   :  { %v292_v18 = vpop.eup %291 }
  0xf7   :  { %v157_v23 = vmul.f32 %v292_v18, %v265_v20 }
  0xf8   :  { %v294_v19 = vpop.eup %293 }
  0xf9   :  { %v156_v21 = vmul.f32 %v294_v19, %v265_v20  ;;  %v161_v24 = vsel %vm65_vm0, %v157_v23, 0.0 }
  0xfb   :  { %v158_v22 = vsel %vm65_vm0, %v156_v21, 0.0 }
  0xfc   :  { %159 = vadd.xlane.f32.xlu0 %v158_v22 }
 0x100   :  { %162 = vadd.xlane.f32.xlu0 %v161_v24 }
 0x185   :  { %v160_v25 = vpop.xlane.xlu0 %159 }
 0x186   :  { %v266_v26 = vmul.f32 -1.442695, %v160_v25 }
 0x188   :  { %295 = vpow2.f32 %v266_v26 }
 0x189   :  { %v163_v27 = vpop.xlane.xlu0 %162 }
 0x18a   :  { %v267_v28 = vmul.f32 -1.442695, %v163_v27 }
 0x18c   :  { %297 = vpow2.f32 %v267_v28 }
 0x195   :  { %v296_v29 = vpop.eup %295 }
 0x196   :  { %v170_v30 = vadd.f32 1.0, %v296_v29 }
 0x198   :  { %299 = vrcp.f32 %v170_v30 }
 0x199   :  { %v298_v31 = vpop.eup %297 }
 0x19a   :  { %v171_v32 = vadd.f32 1.0, %v298_v31 }
 0x19c   :  { %301 = vrcp.f32 %v171_v32 }
 0x1a5   :  { %v300_v35 = vpop.eup %299 }
 0x1a6   :  { %v191_v36 = vmul.f32 %v300_v35, %v183_v33 }
 0x1a8   :  { %v210_v39 = vmul.f32 %v191_v36, %v52_v2  ;;  %v200_v44 = vrot.slane %v191_v36, %v199_v38 }
 0x1a9   :  { %v302_v40 = vpop.eup %301 }
 0x1aa   :  { %v212_v41 = vsel %vm65_vm0, %v210_v39, 0.0  ;;  %v192_v42 = vmul.f32 %v302_v40, %v190_v37 }
 0x1ab   :  { %v213_v43 = vrot.slane %v212_v41, 4 }
 0x1ac   :  { %v204_v45 = vrot.slane %v192_v42, %v199_v38  ;;  %v211_v46 = vmul.f32 %v192_v42, %v53_v5 }
 0x1ad   :  { %v214_v47 = vadd.f32 %v213_v43, %v212_v41 }
 0x1ae   :  { %v219_v48 = vsel %vm65_vm0, %v211_v46, 0.0  ;;  %v206_v49 = vsel %vm205_vm1, %v204_v45, %v200_v44 }
 0x1af   :  { %v215_v50 = vrot.slane %v214_v47, 2  ;;  %v220_v51 = vrot.slane %v219_v48, 4  ;;  %209 = vst.msk [vmem:[#allocation8] sm:$0x3] %vm208_vm2, %v206_v49 }
 0x1b0   :  { %354 = shalt.err (!%p351_p0)
}
 0x1b1   :  { %251 = dma.vmem_to_hbm [thread:$0]  %s249_s3, 32, %s467_s6, [#allocation9]   ;;  %v216_v52 = vadd.f32 %v215_v50, %v214_v47  ;;  %v221_v53 = vadd.f32 %v220_v51, %v219_v48  ;;  %vm230_vm3 = vcmask 254976  }
 0x1b2   :  { %s396_s15 = smov [#allocation7]  }
 0x1b3   :  { %v222_v54 = vrot.slane %v221_v53, 2  ;;  %v217_v55 = vrot.slane %v216_v52, 1  ;;  %s238_s16 = sshll.u32 %s396_s15, 4  ;;  %s239_s16 = int_to_ptr.vmem [resolvable:$true] %s238_s16 }
 0x1b4   :  { %s363_s17 = scalar_lea.vmem %s239_s16, 32  ;;  %p368_p2 = scmp.lt.s32.totalorder %s239_s16, %s239_s16 }
 0x1b5   :  { %v223_v56 = vadd.f32 %v222_v54, %v221_v53  ;;  %v218_v58 = vadd.f32 %v217_v55, %v216_v52  ;;  %p364_p1 = scmp.ne.s32.totalorder %s239_s16, %s363_s17  ;;  %p369_p3 = scmp.lt.s32.totalorder %s363_s17, %s363_s17 }
 0x1b7   :  { %v224_v57 = vrot.slane %v223_v56, 1  ;;  %p370_p4 = por %p369_p3, %p368_p2 }
 0x1b9   :  { %v225_v59 = vadd.f32 %v224_v57, %v223_v56  ;;  %p371_p5 = pnand %p370_p4, %p364_p1 }
 0x1bb   :  { %v228_v60 = vsel %vm205_vm1, %v225_v59, %v218_v58 }
 0x1bc   :  { %231 = vst.msk [vmem:[#allocation7] sm:$0x3] %vm230_vm3, %v228_v60 }
 0x1bd   :  { %374 = shalt.err (!%p371_p5)
}
 0x1be   :  { %241 = dma.vmem_to_hbm [thread:$0]  %s239_s16, 32, %s466_s5, [#allocation4]  }
 0x1bf   :  { %387 = dma.done.wait [#allocation4], 32  }
 0x1c0   :  { %388 = vsyncadd [#allocation4], 4294967264 }
 0x1c1   :  { %389 = dma.done.wait [#allocation9], 32  }
 0x1c2   :  { %390 = vsyncadd [#allocation9], 4294967264 }
 0x1c3   :  { %258 = vsyncpa [#allocation3], 1 }
 0x1c4   :  { %259 = vsyncpa [#allocation6], 1 }
 0x1c5   :  { %260 = vsyncpa [#allocation4], 1 }
 0x1c6   :  { %261 = vsyncpa [#allocation9], 1 }

</bundles_post_ra>
